<compile_context>
chip_gen: v5e
topology: v5e:2x2
jax: 0.10.0
libtpu: 0.0.40
codegen_flags: <defaults>
</compile_context>

<pallas_src>
import jax
import jax.numpy as jnp
from jax import lax
from jax.experimental import pallas as pl
from jax.experimental.pallas import tpu as pltpu

INPUT_SIZE = 16
OUTPUT_SIZE = 4
HIDDEN = (64, 128, 64, 32)

_LANE = 128
_DEFAULT_BLOCK_B = 2048   # lane-axis batch tile; multiple of 128

_SQRT_2_OVER_PI = 0.7978845608028654


def _round_up(n, m):
    return ((n + m - 1) // m) * m


def _gelu_tanh(x):
    # tanh-approx GELU: tanh runs on the EUP (separate VLIW slot) instead of the
    # ~20-op VALU erf polynomial.  ~1e-3 abs drift vs PyTorch's default exact-erf F.gelu.
    return 0.5 * x * (1.0 + jnp.tanh(_SQRT_2_OVER_PI * (x + 0.044715 * x * x * x)))


def mpc_policy_kernel(x_ref,
                      w1_ref, b1_ref,
                      w2_ref, b2_ref,
                      w3_ref, b3_ref,
                      w4_ref, b4_ref,
                      w5_ref, b5_ref,
                      o_ref):
    h = x_ref[...]                                                                  # [in, TB]

    h = _gelu_tanh(jnp.dot(w1_ref[...], h, preferred_element_type=jnp.float32) + b1_ref[...])
    h = _gelu_tanh(jnp.dot(w2_ref[...], h, preferred_element_type=jnp.float32) + b2_ref[...])
    h = _gelu_tanh(jnp.dot(w3_ref[...], h, preferred_element_type=jnp.float32) + b3_ref[...])
    h = _gelu_tanh(jnp.dot(w4_ref[...], h, preferred_element_type=jnp.float32) + b4_ref[...])
    h = jnp.dot(w5_ref[...], h, preferred_element_type=jnp.float32) + b5_ref[...]   # [out, TB]
    o_ref[...] = jnp.tanh(h)


def mpc_policy_net(x, params, *, block_b=_DEFAULT_BLOCK_B, core_parallel=False):
    """x: [B, input_size] f32.  params: list of (W [out, in], b [out, 1]) f32 pairs."""
    B, in_size = x.shape
    out_size = params[-1][0].shape[0]

    # Lane-axis batch tile: multiple of 128, no larger than needed for small B.
    block_b = max(_LANE, _round_up(block_b, _LANE))
    tb = min(block_b, _round_up(B, _LANE))
    b_padded = _round_up(B, tb)

    # Batch-in-lanes: transpose to [F, B] and pad the lane axis. Padded columns are
    # garbage-but-finite and are sliced off below.
    xt = x.T
    if b_padded != B:
        xt = jnp.pad(xt, ((0, 0), (0, b_padded - B)))

    flat = []
    for w, b in params:
        flat += [w, b]

    def resident(a):
        # Full-shape block + constant index_map -> DMA'd once, stays VMEM-resident.
        return pl.BlockSpec(a.shape, lambda i: (0, 0))

    in_specs = [pl.BlockSpec((in_size, tb), lambda i: (0, i))]
    in_specs += [resident(a) for a in flat]

    # Advisory cost estimate so XLA can schedule around this small custom call.
    sizes = [in_size] + [w.shape[0] for w, _ in params]
    flops_per_sample = sum(2 * a * b for a, b in zip(sizes[:-1], sizes[1:]))
    transc_per_sample = sum(w.shape[0] for w, _ in params)   # one tanh per activation element
    param_bytes = sum(int(a.size) * a.dtype.itemsize for a in flat)
    cost = pl.CostEstimate(
        flops=flops_per_sample * b_padded,
        transcendentals=transc_per_sample * b_padded,
        bytes_accessed=b_padded * (in_size + out_size) * 4 + param_bytes,
    )

    # Plain "parallel" is portable (no-op on single-TC v5e/v6e); CORE_PARALLEL is the
    # explicit v7x 2-TC sharding knob (only useful when the grid has >=2 steps).
    sem = (pltpu.CORE_PARALLEL,) if core_parallel else ("parallel",)

    out = pl.pallas_call(
        mpc_policy_kernel,
        out_shape=jax.ShapeDtypeStruct((out_size, b_padded), jnp.float32),
        grid_spec=pl.GridSpec(
            grid=(b_padded // tb,),
            in_specs=in_specs,
            out_specs=pl.BlockSpec((out_size, tb), lambda i: (0, i)),
        ),
        compiler_params=pltpu.CompilerParams(dimension_semantics=sem),
        cost_estimate=cost,
    )(xt, *flat)

    if b_padded != B:
        out = out[:, :B]
    return out.T


def init_params(key, input_size, output_size):
    """Deterministic init mimicking nn.Linear default (uniform +/- 1/sqrt(fan_in)).

    Weights are stored in PyTorch layout [out, in]; biases as [out, 1].
    """
    sizes = [input_size, *HIDDEN, output_size]
    params = []
    for i in range(len(sizes) - 1):
        fan_in, fan_out = sizes[i], sizes[i + 1]
        key, kw, kb = jax.random.split(key, 3)
        bound = 1.0 / float(jnp.sqrt(fan_in))
        w = jax.random.uniform(kw, (fan_out, fan_in), jnp.float32, -bound, bound)
        b = jax.random.uniform(kb, (fan_out, 1), jnp.float32, -bound, bound)
        params.append((w, b))
    return params


def reference_forward(x, params, *, exact_gelu=True):
    """Pure-JAX reference.  exact_gelu=True matches PyTorch F.gelu (erf form)."""
    h = x
    n = len(params)
    for i, (w, b) in enumerate(params):
        h = jnp.dot(h, w.T, precision=lax.Precision.HIGHEST) + b[:, 0]
        if i < n - 1:
            if exact_gelu:
                h = 0.5 * h * (1.0 + lax.erf(h * jnp.float32(0.7071067811865476)))
            else:
                h = _gelu_tanh(h)
        else:
            h = jnp.tanh(h)
    return h


if __name__ == "__main__":
    key = jax.random.PRNGKey(0)
    key, kx = jax.random.split(key)

    # Small test: batch of 8 MPC states (16-dim) -> 4-dim action.
    B = 8
    x = jax.random.normal(kx, (B, INPUT_SIZE), jnp.float32)
    params = init_params(key, INPUT_SIZE, OUTPUT_SIZE)

    out = jax.block_until_ready(mpc_policy_net(x, params))
    assert out.shape == (B, OUTPUT_SIZE), out.shape

    # Tight check vs a reference using the same tanh-approx GELU (validates the kernel).
    ref_approx = reference_forward(x, params, exact_gelu=False)
    err_a = float(jnp.max(jnp.abs(out - ref_approx)))
    assert jnp.allclose(out, ref_approx, atol=1e-4, rtol=1e-4), err_a
    # Loose check vs PyTorch-exact erf GELU (documents the ~1e-3 approximation drift).
    ref_exact = reference_forward(x, params, exact_gelu=True)
    err_e = float(jnp.max(jnp.abs(out - ref_exact)))
    assert jnp.allclose(out, ref_exact, atol=2e-2, rtol=2e-2), err_e

    # Exercise the batch grid: multiple tiles + non-multiple batch (padding path).
    key, kx2 = jax.random.split(key)
    B2 = 300
    x2 = jax.random.normal(kx2, (B2, INPUT_SIZE), jnp.float32)
    out2 = jax.block_until_ready(mpc_policy_net(x2, params, block_b=256))
    assert out2.shape == (B2, OUTPUT_SIZE), out2.shape
    ref2 = reference_forward(x2, params, exact_gelu=False)
    err2 = float(jnp.max(jnp.abs(out2 - ref2)))
    assert jnp.allclose(out2, ref2, atol=1e-4, rtol=1e-4), err2

    print("KERNEL_OK")
</pallas_src>

<mosaic_0001>
module attributes {stable_mosaic.version = 11 : i64} {
  func.func @mpc_policy_kernel(%arg0: i32, %arg1: memref<16x128xf32, #tpu.memory_space<vmem>>, %arg2: memref<64x16xf32, #tpu.memory_space<vmem>>, %arg3: memref<64x1xf32, #tpu.memory_space<vmem>>, %arg4: memref<128x64xf32, #tpu.memory_space<vmem>>, %arg5: memref<128x1xf32, #tpu.memory_space<vmem>>, %arg6: memref<64x128xf32, #tpu.memory_space<vmem>>, %arg7: memref<64x1xf32, #tpu.memory_space<vmem>>, %arg8: memref<32x64xf32, #tpu.memory_space<vmem>>, %arg9: memref<32x1xf32, #tpu.memory_space<vmem>>, %arg10: memref<4x32xf32, #tpu.memory_space<vmem>>, %arg11: memref<4x1xf32, #tpu.memory_space<vmem>>, %arg12: memref<4x128xf32, #tpu.memory_space<vmem>>) attributes {dimension_semantics = [#tpu.dimension_semantics<parallel>], iteration_bounds = array<i64: 1>, scalar_prefetch = 0 : i64, scratch_operands = 0 : i64, tpu.core_type = #tpu.core_type<tc>, window_params = [{transform_indices = @transform_0, window_bounds = array<i64: 16, 128>}, {pipeline_mode = #tpu.pipeline_mode<synchronous>, transform_indices = @transform_1, window_bounds = array<i64: 64, 16>}, {pipeline_mode = #tpu.pipeline_mode<synchronous>, transform_indices = @transform_2, window_bounds = array<i64: 64, 1>}, {pipeline_mode = #tpu.pipeline_mode<synchronous>, transform_indices = @transform_3, window_bounds = array<i64: 128, 64>}, {pipeline_mode = #tpu.pipeline_mode<synchronous>, transform_indices = @transform_4, window_bounds = array<i64: 128, 1>}, {pipeline_mode = #tpu.pipeline_mode<synchronous>, transform_indices = @transform_5, window_bounds = array<i64: 64, 128>}, {pipeline_mode = #tpu.pipeline_mode<synchronous>, transform_indices = @transform_6, window_bounds = array<i64: 64, 1>}, {pipeline_mode = #tpu.pipeline_mode<synchronous>, transform_indices = @transform_7, window_bounds = array<i64: 32, 64>}, {pipeline_mode = #tpu.pipeline_mode<synchronous>, transform_indices = @transform_8, window_bounds = array<i64: 32, 1>}, {pipeline_mode = #tpu.pipeline_mode<synchronous>, transform_indices = @transform_9, window_bounds = array<i64: 4, 32>}, {pipeline_mode = #tpu.pipeline_mode<synchronous>, transform_indices = @transform_10, window_bounds = array<i64: 4, 1>}, {transform_indices = @transform_11, window_bounds = array<i64: 4, 128>}]} {
    %c0 = arith.constant 0 : index
    %c0_0 = arith.constant 0 : index
    %0 = vector.load %arg1[%c0, %c0_0] : memref<16x128xf32, #tpu.memory_space<vmem>>, vector<16x128xf32>
    %c0_1 = arith.constant 0 : index
    %c0_2 = arith.constant 0 : index
    %1 = vector.load %arg2[%c0_1, %c0_2] : memref<64x16xf32, #tpu.memory_space<vmem>>, vector<64x16xf32>
    %cst = arith.constant dense<0.000000e+00> : vector<64x128xf32>
    %2 = tpu.matmul %1, %0, %cst {dimension_numbers = #tpu.dot_dimension_numbers<[1], [0], [0], [1], [0, 0, 1, 1], [], []>} : vector<64x16xf32>, vector<16x128xf32>, vector<64x128xf32> -> vector<64x128xf32>
    %c0_3 = arith.constant 0 : index
    %c0_4 = arith.constant 0 : index
    %3 = vector.load %arg3[%c0_3, %c0_4] : memref<64x1xf32, #tpu.memory_space<vmem>>, vector<64x1xf32>
    %4 = vector.broadcast %3 : vector<64x1xf32> to vector<64x128xf32>
    %5 = arith.addf %2, %4 : vector<64x128xf32>
    %cst_5 = arith.constant 5.000000e-01 : f32
    %6 = vector.broadcast %cst_5 : f32 to vector<64x128xf32>
    %7 = arith.mulf %6, %5 : vector<64x128xf32>
    %cst_6 = arith.constant 4.471500e-02 : f32
    %8 = vector.broadcast %cst_6 : f32 to vector<64x128xf32>
    %9 = arith.mulf %8, %5 : vector<64x128xf32>
    %10 = arith.mulf %9, %5 : vector<64x128xf32>
    %11 = arith.mulf %10, %5 : vector<64x128xf32>
    %12 = arith.addf %5, %11 : vector<64x128xf32>
    %cst_7 = arith.constant 0.797884583 : f32
    %13 = vector.broadcast %cst_7 : f32 to vector<64x128xf32>
    %14 = arith.mulf %13, %12 : vector<64x128xf32>
    %15 = math.tanh %14 : vector<64x128xf32>
    %cst_8 = arith.constant 1.000000e+00 : f32
    %16 = vector.broadcast %cst_8 : f32 to vector<64x128xf32>
    %17 = arith.addf %16, %15 : vector<64x128xf32>
    %18 = arith.mulf %7, %17 : vector<64x128xf32>
    %c0_9 = arith.constant 0 : index
    %c0_10 = arith.constant 0 : index
    %19 = vector.load %arg4[%c0_9, %c0_10] : memref<128x64xf32, #tpu.memory_space<vmem>>, vector<128x64xf32>
    %cst_11 = arith.constant dense<0.000000e+00> : vector<128x128xf32>
    %20 = tpu.matmul %19, %18, %cst_11 {dimension_numbers = #tpu.dot_dimension_numbers<[1], [0], [0], [1], [0, 0, 1, 1], [], []>} : vector<128x64xf32>, vector<64x128xf32>, vector<128x128xf32> -> vector<128x128xf32>
    %c0_12 = arith.constant 0 : index
    %c0_13 = arith.constant 0 : index
    %21 = vector.load %arg5[%c0_12, %c0_13] : memref<128x1xf32, #tpu.memory_space<vmem>>, vector<128x1xf32>
    %22 = vector.broadcast %21 : vector<128x1xf32> to vector<128x128xf32>
    %23 = arith.addf %20, %22 : vector<128x128xf32>
    %cst_14 = arith.constant 5.000000e-01 : f32
    %24 = vector.broadcast %cst_14 : f32 to vector<128x128xf32>
    %25 = arith.mulf %24, %23 : vector<128x128xf32>
    %cst_15 = arith.constant 4.471500e-02 : f32
    %26 = vector.broadcast %cst_15 : f32 to vector<128x128xf32>
    %27 = arith.mulf %26, %23 : vector<128x128xf32>
    %28 = arith.mulf %27, %23 : vector<128x128xf32>
    %29 = arith.mulf %28, %23 : vector<128x128xf32>
    %30 = arith.addf %23, %29 : vector<128x128xf32>
    %cst_16 = arith.constant 0.797884583 : f32
    %31 = vector.broadcast %cst_16 : f32 to vector<128x128xf32>
    %32 = arith.mulf %31, %30 : vector<128x128xf32>
    %33 = math.tanh %32 : vector<128x128xf32>
    %cst_17 = arith.constant 1.000000e+00 : f32
    %34 = vector.broadcast %cst_17 : f32 to vector<128x128xf32>
    %35 = arith.addf %34, %33 : vector<128x128xf32>
    %36 = arith.mulf %25, %35 : vector<128x128xf32>
    %c0_18 = arith.constant 0 : index
    %c0_19 = arith.constant 0 : index
    %37 = vector.load %arg6[%c0_18, %c0_19] : memref<64x128xf32, #tpu.memory_space<vmem>>, vector<64x128xf32>
    %cst_20 = arith.constant dense<0.000000e+00> : vector<64x128xf32>
    %38 = tpu.matmul %37, %36, %cst_20 {dimension_numbers = #tpu.dot_dimension_numbers<[1], [0], [0], [1], [0, 0, 1, 1], [], []>} : vector<64x128xf32>, vector<128x128xf32>, vector<64x128xf32> -> vector<64x128xf32>
    %c0_21 = arith.constant 0 : index
    %c0_22 = arith.constant 0 : index
    %39 = vector.load %arg7[%c0_21, %c0_22] : memref<64x1xf32, #tpu.memory_space<vmem>>, vector<64x1xf32>
    %40 = vector.broadcast %39 : vector<64x1xf32> to vector<64x128xf32>
    %41 = arith.addf %38, %40 : vector<64x128xf32>
    %cst_23 = arith.constant 5.000000e-01 : f32
    %42 = vector.broadcast %cst_23 : f32 to vector<64x128xf32>
    %43 = arith.mulf %42, %41 : vector<64x128xf32>
    %cst_24 = arith.constant 4.471500e-02 : f32
    %44 = vector.broadcast %cst_24 : f32 to vector<64x128xf32>
    %45 = arith.mulf %44, %41 : vector<64x128xf32>
    %46 = arith.mulf %45, %41 : vector<64x128xf32>
    %47 = arith.mulf %46, %41 : vector<64x128xf32>
    %48 = arith.addf %41, %47 : vector<64x128xf32>
    %cst_25 = arith.constant 0.797884583 : f32
    %49 = vector.broadcast %cst_25 : f32 to vector<64x128xf32>
    %50 = arith.mulf %49, %48 : vector<64x128xf32>
    %51 = math.tanh %50 : vector<64x128xf32>
    %cst_26 = arith.constant 1.000000e+00 : f32
    %52 = vector.broadcast %cst_26 : f32 to vector<64x128xf32>
    %53 = arith.addf %52, %51 : vector<64x128xf32>
    %54 = arith.mulf %43, %53 : vector<64x128xf32>
    %c0_27 = arith.constant 0 : index
    %c0_28 = arith.constant 0 : index
    %55 = vector.load %arg8[%c0_27, %c0_28] : memref<32x64xf32, #tpu.memory_space<vmem>>, vector<32x64xf32>
    %cst_29 = arith.constant dense<0.000000e+00> : vector<32x128xf32>
    %56 = tpu.matmul %55, %54, %cst_29 {dimension_numbers = #tpu.dot_dimension_numbers<[1], [0], [0], [1], [0, 0, 1, 1], [], []>} : vector<32x64xf32>, vector<64x128xf32>, vector<32x128xf32> -> vector<32x128xf32>
    %c0_30 = arith.constant 0 : index
    %c0_31 = arith.constant 0 : index
    %57 = vector.load %arg9[%c0_30, %c0_31] : memref<32x1xf32, #tpu.memory_space<vmem>>, vector<32x1xf32>
    %58 = vector.broadcast %57 : vector<32x1xf32> to vector<32x128xf32>
    %59 = arith.addf %56, %58 : vector<32x128xf32>
    %cst_32 = arith.constant 5.000000e-01 : f32
    %60 = vector.broadcast %cst_32 : f32 to vector<32x128xf32>
    %61 = arith.mulf %60, %59 : vector<32x128xf32>
    %cst_33 = arith.constant 4.471500e-02 : f32
    %62 = vector.broadcast %cst_33 : f32 to vector<32x128xf32>
    %63 = arith.mulf %62, %59 : vector<32x128xf32>
    %64 = arith.mulf %63, %59 : vector<32x128xf32>
    %65 = arith.mulf %64, %59 : vector<32x128xf32>
    %66 = arith.addf %59, %65 : vector<32x128xf32>
    %cst_34 = arith.constant 0.797884583 : f32
    %67 = vector.broadcast %cst_34 : f32 to vector<32x128xf32>
    %68 = arith.mulf %67, %66 : vector<32x128xf32>
    %69 = math.tanh %68 : vector<32x128xf32>
    %cst_35 = arith.constant 1.000000e+00 : f32
    %70 = vector.broadcast %cst_35 : f32 to vector<32x128xf32>
    %71 = arith.addf %70, %69 : vector<32x128xf32>
    %72 = arith.mulf %61, %71 : vector<32x128xf32>
    %c0_36 = arith.constant 0 : index
    %c0_37 = arith.constant 0 : index
    %73 = vector.load %arg10[%c0_36, %c0_37] : memref<4x32xf32, #tpu.memory_space<vmem>>, vector<4x32xf32>
    %cst_38 = arith.constant dense<0.000000e+00> : vector<4x128xf32>
    %74 = tpu.matmul %73, %72, %cst_38 {dimension_numbers = #tpu.dot_dimension_numbers<[1], [0], [0], [1], [0, 0, 1, 1], [], []>} : vector<4x32xf32>, vector<32x128xf32>, vector<4x128xf32> -> vector<4x128xf32>
    %c0_39 = arith.constant 0 : index
    %c0_40 = arith.constant 0 : index
    %75 = vector.load %arg11[%c0_39, %c0_40] : memref<4x1xf32, #tpu.memory_space<vmem>>, vector<4x1xf32>
    %76 = vector.broadcast %75 : vector<4x1xf32> to vector<4x128xf32>
    %77 = arith.addf %74, %76 : vector<4x128xf32>
    %78 = math.tanh %77 : vector<4x128xf32>
    %c0_41 = arith.constant 0 : index
    %c0_42 = arith.constant 0 : index
    %79 = vector.load %arg12[%c0_41, %c0_42] : memref<4x128xf32, #tpu.memory_space<vmem>>, vector<4x128xf32>
    tpu.vector_store %arg12[%c0_41, %c0_42], %78 {strides = array<i32>} : memref<4x128xf32, #tpu.memory_space<vmem>>, vector<4x128xf32>,
    return
  }
  func.func @transform_0(%arg0: i32) -> (i32, i32) {
    %c0_i32 = arith.constant 0 : i32
    %c0_i32_0 = arith.constant 0 : i32
    return %c0_i32, %arg0 : i32, i32
  }
  func.func @transform_1(%arg0: i32) -> (i32, i32) {
    %c0_i32 = arith.constant 0 : i32
    %c0_i32_0 = arith.constant 0 : i32
    %c0_i32_1 = arith.constant 0 : i32
    return %c0_i32, %c0_i32_0 : i32, i32
  }
  func.func @transform_2(%arg0: i32) -> (i32, i32) {
    %c0_i32 = arith.constant 0 : i32
    %c0_i32_0 = arith.constant 0 : i32
    %c0_i32_1 = arith.constant 0 : i32
    return %c0_i32, %c0_i32_0 : i32, i32
  }
  func.func @transform_3(%arg0: i32) -> (i32, i32) {
    %c0_i32 = arith.constant 0 : i32
    %c0_i32_0 = arith.constant 0 : i32
    %c0_i32_1 = arith.constant 0 : i32
    return %c0_i32, %c0_i32_0 : i32, i32
  }
  func.func @transform_4(%arg0: i32) -> (i32, i32) {
    %c0_i32 = arith.constant 0 : i32
    %c0_i32_0 = arith.constant 0 : i32
    %c0_i32_1 = arith.constant 0 : i32
    return %c0_i32, %c0_i32_0 : i32, i32
  }
  func.func @transform_5(%arg0: i32) -> (i32, i32) {
    %c0_i32 = arith.constant 0 : i32
    %c0_i32_0 = arith.constant 0 : i32
    %c0_i32_1 = arith.constant 0 : i32
    return %c0_i32, %c0_i32_0 : i32, i32
  }
  func.func @transform_6(%arg0: i32) -> (i32, i32) {
    %c0_i32 = arith.constant 0 : i32
    %c0_i32_0 = arith.constant 0 : i32
    %c0_i32_1 = arith.constant 0 : i32
    return %c0_i32, %c0_i32_0 : i32, i32
  }
  func.func @transform_7(%arg0: i32) -> (i32, i32) {
    %c0_i32 = arith.constant 0 : i32
    %c0_i32_0 = arith.constant 0 : i32
    %c0_i32_1 = arith.constant 0 : i32
    return %c0_i32, %c0_i32_0 : i32, i32
  }
  func.func @transform_8(%arg0: i32) -> (i32, i32) {
    %c0_i32 = arith.constant 0 : i32
    %c0_i32_0 = arith.constant 0 : i32
    %c0_i32_1 = arith.constant 0 : i32
    return %c0_i32, %c0_i32_0 : i32, i32
  }
  func.func @transform_9(%arg0: i32) -> (i32, i32) {
    %c0_i32 = arith.constant 0 : i32
    %c0_i32_0 = arith.constant 0 : i32
    %c0_i32_1 = arith.constant 0 : i32
    return %c0_i32, %c0_i32_0 : i32, i32
  }
  func.func @transform_10(%arg0: i32) -> (i32, i32) {
    %c0_i32 = arith.constant 0 : i32
    %c0_i32_0 = arith.constant 0 : i32
    %c0_i32_1 = arith.constant 0 : i32
    return %c0_i32, %c0_i32_0 : i32, i32
  }
  func.func @transform_11(%arg0: i32) -> (i32, i32) {
    %c0_i32 = arith.constant 0 : i32
    %c0_i32_0 = arith.constant 0 : i32
    return %c0_i32, %arg0 : i32, i32
  }
}

</mosaic_0001>

<bundles_post_ra>
// kernel: tpu_custom_call.1
= control target key start
LH: loop header
LB: loop body
LE: loop exit
PB: predicated region body
PF: predicated region fallthrough
CT: control target
= control target key end

     0   :  { %v1078_v3 = vmov 0   ;;  %vm97_vm0 = vcmask 130048   ;;  %s1613_s0 = inlined_call_operand.vmem [shape: f32[16,128], index: 0, kind: input, shape index: {}]   ;;  %s1614_s1 = inlined_call_operand.vmem [shape: f32[64,16], index: 1, kind: input, shape index: {}]   ;;  %s1615_s2 = inlined_call_operand.vmem [shape: f32[64,1], index: 2, kind: input, shape index: {}]   ;;  %s1616_s3 = inlined_call_operand.vmem [shape: f32[128,64], index: 3, kind: input, shape index: {}]   ;;  %s1617_s4 = inlined_call_operand.vmem [shape: f32[128,1], index: 4, kind: input, shape index: {}]   ;;  %s1618_s5 = inlined_call_operand.vmem [shape: f32[64,128], index: 5, kind: input, shape index: {}]   ;;  %s1619_s6 = inlined_call_operand.vmem [shape: f32[64,1], index: 6, kind: input, shape index: {}]   ;;  %s1620_s7 = inlined_call_operand.vmem [shape: f32[32,64], index: 7, kind: input, shape index: {}]   ;;  %s1621_s8 = inlined_call_operand.vmem [shape: f32[32,1], index: 8, kind: input, shape index: {}]   ;;  %s1622_s9 = inlined_call_operand.vmem [shape: f32[4,32], index: 9, kind: input, shape index: {}]   ;;  %s1623_s10 = inlined_call_operand.vmem [shape: f32[4,1], index: 10, kind: input, shape index: {}]   ;;  %s1624_s11 = inlined_call_operand.hbm [shape: f32[4,128], index: 11, kind: output, shape index: {}]  }
   0x1   :  { %v40_v0 = vld [vmem:[%s1613_s0 + $0x8] sm:$0xff]  ;;  %v56_v1 = vld [vmem:[%s1615_s2 + $0x38] sm:$0xff]  ;;  %976 = vset.pattern.permute.xlu1 %v1078_v3  ;;  %975 = vset.pattern.permute.xlu0 %v1078_v3  ;;  %v39_v4 = vld [vmem:[%s1613_s0] sm:$0xff] }
   0x2   :  { %v54_v2 = vld [vmem:[%s1615_s2 + $0x28] sm:$0xff]  ;;  %v52_v5 = vld [vmem:[%s1615_s2 + $0x18] sm:$0xff]  ;;  %136 = vmatpush.msra.mxu0 %v40_v0  ;;  %94 = vperm.xlu0 %975, %v56_v1   ;;  %v41_v6 = vld [vmem:[%s1614_s1] sm:$0xff] }
   0x3   :  { %84 = vperm.xlu1 %976, %v54_v2   ;;  %977 = vset.pattern.permute.xlu2 %v1078_v3  ;;  %v55_v7 = vld [vmem:[%s1615_s2 + $0x30] sm:$0xff] }
   0x4   :  { %137 = vmatpush.msra.mxu0 %v39_v4  ;;  %74 = vperm.xlu2 %977, %v52_v5  }
   0x5   :  { %928 = vmatmul.msk.f32.vlgmr.msra.gmra.mxu0 %vm97_vm0, %v41_v6 }
   0x6   :  { %16 = vsyncpa [#allocation3], 0  ;;  %v53_v8 = vld [vmem:[%s1615_s2 + $0x20] sm:$0xff]  ;;  %v51_v9 = vld [vmem:[%s1615_s2 + $0x10] sm:$0xff]  ;;  %vm347_vm1 = vcmask 523264   ;;  %vm886_vm2 = vcmask 261120  }
   0x7   :  { %v42_v10 = vld [vmem:[%s1614_s1 + $0x8] sm:$0xff]  ;;  %v49_v12 = vld [vmem:[%s1615_s2] sm:$0xff]  ;;  %v266_v13 = vld [vmem:[%s1617_s4 + $0x78] sm:$0xff]  ;;  %s1079_s26 = smov [#allocation2]  }
   0x8   :  { %v50_v11 = vld [vmem:[%s1615_s2 + $0x8] sm:$0xff]  ;;  %v43_v14 = vld [vmem:[%s1614_s1 + $0x10] sm:$0xff]  ;;  %v263_v17 = vld [vmem:[%s1617_s4 + $0x60] sm:$0xff]  ;;  %s917_s27 = sshll.u32 %s1079_s26, 4  ;;  %s918_s27 = int_to_ptr.vmem [resolvable:$true] %s917_s27 }
   0x9   :  { %v265_v15 = vld [vmem:[%s1617_s4 + $0x70] sm:$0xff]  ;;  %v264_v16 = vld [vmem:[%s1617_s4 + $0x68] sm:$0xff]  ;;  %v44_v18 = vld [vmem:[%s1614_s1 + $0x18] sm:$0xff] }
   0xa   :  { %89 = vperm.xlu0 %975, %v55_v7   ;;  %v262_v19 = vld [vmem:[%s1617_s4 + $0x58] sm:$0xff]  ;;  %v261_v20 = vld [vmem:[%s1617_s4 + $0x50] sm:$0xff]  ;;  %v260_v21 = vld [vmem:[%s1617_s4 + $0x48] sm:$0xff] }
   0xb   :  { %79 = vperm.xlu1 %976, %v53_v8   ;;  %v45_v22 = vld [vmem:[%s1614_s1 + $0x20] sm:$0xff]  ;;  %v258_v24 = vld [vmem:[%s1617_s4 + $0x38] sm:$0xff]  ;;  %v257_v25 = vld [vmem:[%s1617_s4 + $0x30] sm:$0xff] }
   0xc   :  { %69 = vperm.xlu2 %977, %v51_v9   ;;  %v259_v23 = vld [vmem:[%s1617_s4 + $0x40] sm:$0xff]  ;;  %v46_v26 = vld [vmem:[%s1614_s1 + $0x28] sm:$0xff]  ;;  %v254_v29 = vld [vmem:[%s1617_s4 + $0x18] sm:$0xff] }
   0xd   :  { %929 = vmatmul.msk.f32.gmra.mxu0 %vm97_vm0, %v42_v10  ;;  %v256_v27 = vld [vmem:[%s1617_s4 + $0x28] sm:$0xff]  ;;  %v255_v28 = vld [vmem:[%s1617_s4 + $0x20] sm:$0xff]  ;;  %v47_v30 = vld [vmem:[%s1614_s1 + $0x30] sm:$0xff] }
   0xe   :  { %v253_v31 = vld [vmem:[%s1617_s4 + $0x10] sm:$0xff]  ;;  %v252_v32 = vld [vmem:[%s1617_s4 + $0x8] sm:$0xff]  ;;  %v251_v33 = vld [vmem:[%s1617_s4] sm:$0xff] }
   0xf   :  { %v48_v34 = vld [vmem:[%s1614_s1 + $0x38] sm:$0xff]  ;;  %v619_v36 = vld [vmem:[%s1619_s6 + $0x30] sm:$0xff]  ;;  %v618_v37 = vld [vmem:[%s1619_s6 + $0x28] sm:$0xff]  ;;  %s919_s1 = sshll.u32 %s1624_s11, 4  ;;  %s920_s1 = int_to_ptr.hbm [resolvable:$true] %s919_s1 }
  0x10   :  { %v620_v35 = vld [vmem:[%s1619_s6 + $0x38] sm:$0xff]  ;;  %v617_v38 = vld [vmem:[%s1619_s6 + $0x20] sm:$0xff]  ;;  %v615_v40 = vld [vmem:[%s1619_s6 + $0x10] sm:$0xff] }
  0x11   :  { %v616_v39 = vld [vmem:[%s1619_s6 + $0x18] sm:$0xff]  ;;  %v614_v41 = vld [vmem:[%s1619_s6 + $0x8] sm:$0xff]  ;;  %v613_v42 = vld [vmem:[%s1619_s6] sm:$0xff] }
  0x12   :  { %64 = vperm.xlu0 %975, %v50_v11   ;;  %v781_v43 = vld [vmem:[%s1621_s8 + $0x18] sm:$0xff]  ;;  %v780_v44 = vld [vmem:[%s1621_s8 + $0x10] sm:$0xff]  ;;  %v779_v45 = vld [vmem:[%s1621_s8 + $0x8] sm:$0xff] }
  0x13   :  { %59 = vperm.xlu1 %976, %v49_v12   ;;  %v778_v46 = vld [vmem:[%s1621_s8] sm:$0xff] }
  0x14   :  { %344 = vperm.xlu2 %977, %v266_v13   ;;  %v880_v47 = vld [vmem:[%s1623_s10] sm:$0xf] }
  0x15   :  { %930 = vmatmul.msk.f32.gmra.mxu0 %vm97_vm0, %v43_v14 }
  0x1a   :  { %339 = vperm.xlu0 %975, %v265_v15  }
  0x1b   :  { %334 = vperm.xlu1 %976, %v264_v16  }
  0x1c   :  { %329 = vperm.xlu2 %977, %v263_v17  }
  0x1d   :  { %931 = vmatmul.msk.f32.gmra.mxu0 %vm97_vm0, %v44_v18 }
  0x22   :  { %324 = vperm.xlu0 %975, %v262_v19  }
  0x23   :  { %319 = vperm.xlu1 %976, %v261_v20  }
  0x24   :  { %314 = vperm.xlu2 %977, %v260_v21  }
  0x25   :  { %932 = vmatmul.msk.f32.gmra.mxu0 %vm97_vm0, %v45_v22 }
  0x2a   :  { %309 = vperm.xlu0 %975, %v259_v23  }
  0x2b   :  { %304 = vperm.xlu1 %976, %v258_v24  }
  0x2c   :  { %299 = vperm.xlu2 %977, %v257_v25  }
  0x2d   :  { %933 = vmatmul.msk.f32.gmra.mxu0 %vm97_vm0, %v46_v26 }
  0x32   :  { %294 = vperm.xlu0 %975, %v256_v27  }
  0x33   :  { %289 = vperm.xlu1 %976, %v255_v28  }
  0x34   :  { %284 = vperm.xlu2 %977, %v254_v29  }
  0x35   :  { %934 = vmatmul.msk.f32.gmra.mxu0 %vm97_vm0, %v47_v30 }
  0x3a   :  { %279 = vperm.xlu0 %975, %v253_v31  }
  0x3b   :  { %274 = vperm.xlu1 %976, %v252_v32  }
  0x3c   :  { %269 = vperm.xlu2 %977, %v251_v33  }
  0x3d   :  { %935 = vmatmul.msk.f32.gmra.mxu0 %vm97_vm0, %v48_v34 }
  0x42   :  { %658 = vperm.xlu0 %975, %v620_v35  }
  0x43   :  { %653 = vperm.xlu1 %976, %v619_v36  }
  0x44   :  { %648 = vperm.xlu2 %977, %v618_v37  }
  0x4a   :  { %643 = vperm.xlu0 %975, %v617_v38  }
  0x4b   :  { %638 = vperm.xlu1 %976, %v616_v39  }
  0x4c   :  { %633 = vperm.xlu2 %977, %v615_v40  }
  0x52   :  { %628 = vperm.xlu0 %975, %v614_v41  }
  0x53   :  { %623 = vperm.xlu1 %976, %v613_v42  }
  0x54   :  { %799 = vperm.xlu2 %977, %v781_v43  }
  0x5a   :  { %794 = vperm.xlu0 %975, %v780_v44  }
  0x5b   :  { %789 = vperm.xlu1 %976, %v779_v45  }
  0x5c   :  { %784 = vperm.xlu2 %977, %v778_v46  }
  0x5e   :  { %v75_v55 = vpop.permute.xlu2 %74 }
  0x62   :  { %883 = vperm.xlu0 %975, %v880_v47  }
  0x66   :  { %v70_v1 = vpop.permute.xlu2 %69 }
  0x74   :  { %v95_v53 = vpop.permute.xlu0 %94 }
  0x75   :  { %v85_v52 = vpop.permute.xlu1 %84 }
  0x7c   :  { %v90_v58 = vpop.permute.xlu0 %89 }
  0x7d   :  { %v80_v57 = vpop.permute.xlu1 %79 }
  0x82   :  { %v139_v48 = vpop.f32.mrf.mxu0 }
  0x84   :  { %v65_v6 = vpop.permute.xlu0 %64 }
  0x85   :  { %v60_v2 = vpop.permute.xlu1 %59 }
  0x86   :  { %v1307_v11 = vadd.f32 %v139_v48, %v60_v2 }
  0x88   :  { %v171_v20 = vmul.f32 0.044715, %v1307_v11 }
  0x8a   :  { %v142_v49 = vpop.f32.mrf.mxu0  ;;  %v179_v29 = vmul.f32 %v171_v20, %v1307_v11  ;;  %v237_v20 = vld [vmem:[%s1616_s3 + $0x10] sm:$0xff] }
  0x8b   :  { %v1303_v8 = vadd.f32 %v142_v49, %v65_v6 }
  0x8c   :  { %v187_v38 = vmul.f32 %v179_v29, %v1307_v11  ;;  %v242_v29 = vld [vmem:[%s1616_s3 + $0x38] sm:$0xff] }
  0x8d   :  { %v172_v19 = vmul.f32 0.044715, %v1303_v8 }
  0x8e   :  { %v195_v45 = vadd.f32 %v187_v38, %v1307_v11 }
  0x8f   :  { %v180_v28 = vmul.f32 %v172_v19, %v1303_v8  ;;  %v235_v19 = vld [vmem:[%s1616_s3] sm:$0xff] }
  0x91   :  { %v188_v37 = vmul.f32 %v180_v28, %v1303_v8  ;;  %v241_v28 = vld [vmem:[%s1616_s3 + $0x30] sm:$0xff] }
  0x92   :  { %v145_v50 = vpop.f32.mrf.mxu0 }
  0x93   :  { %v1298_v3 = vadd.f32 %v145_v50, %v70_v1  ;;  %v196_v43 = vadd.f32 %v188_v37, %v1303_v8  ;;  %v203_v50 = vmul.f32 0.7978846, %v195_v45  ;;  %v345_v37 = vpop.permute.xlu2 %344 }
  0x95   :  { %v173_v14 = vmul.f32 0.044715, %v1298_v3  ;;  %v204_v47 = vmul.f32 0.7978846, %v196_v43 }
  0x97   :  { %v181_v24 = vmul.f32 %v173_v14, %v1298_v3 }
  0x99   :  { %v189_v33 = vmul.f32 %v181_v24, %v1298_v3  ;;  %v239_v24 = vld [vmem:[%s1616_s3 + $0x20] sm:$0xff] }
  0x9a   :  { %v148_v51 = vpop.f32.mrf.mxu0 }
  0x9b   :  { %v1294_v63 = vadd.f32 %v148_v51, %v75_v55  ;;  %v197_v41 = vadd.f32 %v189_v33, %v1298_v3 }
  0x9d   :  { %v174_v10 = vmul.f32 0.044715, %v1294_v63  ;;  %v205_v44 = vmul.f32 0.7978846, %v197_v41  ;;  %v330_v41 = vpop.permute.xlu2 %329 }
  0x9f   :  { %v182_v18 = vmul.f32 %v174_v10, %v1294_v63 }
  0xa1   :  { %v190_v27 = vmul.f32 %v182_v18, %v1294_v63  ;;  %v163_v18 = vmul.f32 0.5, %v1307_v11  ;;  %v246_v11 = vld [vmem:[%s1616_s3 + $0x58] sm:$0xff] }
  0xa2   :  { %v151_v54 = vpop.f32.mrf.mxu0 }
  0xa3   :  { %v1291_v60 = vadd.f32 %v151_v54, %v80_v57  ;;  %v198_v36 = vadd.f32 %v190_v27, %v1294_v63  ;;  %v250_v27 = vld [vmem:[%s1616_s3 + $0x78] sm:$0xff] }
  0xa5   :  { %v175_v5 = vmul.f32 0.044715, %v1291_v60  ;;  %v206_v42 = vmul.f32 0.7978846, %v198_v36 }
  0xa7   :  { %v183_v13 = vmul.f32 %v175_v5, %v1291_v60  ;;  %v167_v5 = vmul.f32 0.5, %v1291_v60 }
  0xa9   :  { %v191_v23 = vmul.f32 %v183_v13, %v1291_v60 }
  0xaa   :  { %v154_v56 = vpop.f32.mrf.mxu0 }
  0xab   :  { %v1289_v59 = vadd.f32 %v154_v56, %v85_v52  ;;  %v199_v32 = vadd.f32 %v191_v23, %v1291_v60  ;;  %v164_v60 = vmul.f32 0.5, %v1303_v8  ;;  %v236_v8 = vld [vmem:[%s1616_s3 + $0x8] sm:$0xff] }
  0xac   :  { %v248_v23 = vld [vmem:[%s1616_s3 + $0x68] sm:$0xff] }
  0xad   :  { %v176_v62 = vmul.f32 0.044715, %v1289_v59  ;;  %v207_v40 = vmul.f32 0.7978846, %v199_v32 }
  0xaf   :  { %v184_v7 = vmul.f32 %v176_v62, %v1289_v59  ;;  %v168_v62 = vmul.f32 0.5, %v1289_v59 }
  0xb1   :  { %v192_v16 = vmul.f32 %v184_v7, %v1289_v59 }
  0xb2   :  { %v157_v61 = vpop.f32.mrf.mxu0 }
  0xb3   :  { %v1296_v0 = vadd.f32 %v157_v61, %v90_v58  ;;  %v200_v25 = vadd.f32 %v192_v16, %v1289_v59  ;;  %v165_v59 = vmul.f32 0.5, %v1298_v3  ;;  %v245_v3 = vld [vmem:[%s1616_s3 + $0x50] sm:$0xff] }
  0xb5   :  { %v177_v4 = vmul.f32 0.044715, %v1296_v0  ;;  %v208_v34 = vmul.f32 0.7978846, %v200_v25  ;;  %v169_v56 = vmul.f32 0.5, %v1296_v0  ;;  %v249_v25 = vld [vmem:[%s1616_s3 + $0x70] sm:$0xff] }
  0xb7   :  { %v185_v9 = vmul.f32 %v177_v4, %v1296_v0 }
  0xb9   :  { %v193_v12 = vmul.f32 %v185_v9, %v1296_v0  ;;  %v166_v9 = vmul.f32 0.5, %v1294_v63 }
  0xba   :  { %v160_v15 = vpop.f32.mrf.mxu0 }
  0xbb   :  { %v161_v17 = vadd.f32 %v160_v15, %v95_v53  ;;  %v201_v22 = vadd.f32 %v193_v12, %v1296_v0 }
  0xbd   :  { %v178_v21 = vmul.f32 0.044715, %v161_v17  ;;  %v209_v31 = vmul.f32 0.7978846, %v201_v22  ;;  %v170_v51 = vmul.f32 0.5, %v161_v17  ;;  %v238_v22 = vld [vmem:[%s1616_s3 + $0x18] sm:$0xff] }
  0xbf   :  { %v186_v26 = vmul.f32 %v178_v21, %v161_v17  ;;  %978 = vtanh.f32 %v209_v31  ;;  %v247_v21 = vld [vmem:[%s1616_s3 + $0x60] sm:$0xff]  ;;  %v244_v31 = vld [vmem:[%s1616_s3 + $0x48] sm:$0xff] }
  0xc0   :  { %980 = vtanh.f32 %v208_v34 }
  0xc1   :  { %v194_v30 = vmul.f32 %v186_v26, %v161_v17  ;;  %v240_v26 = vld [vmem:[%s1616_s3 + $0x28] sm:$0xff] }
  0xc3   :  { %v202_v35 = vadd.f32 %v194_v30, %v161_v17  ;;  %v243_v30 = vld [vmem:[%s1616_s3 + $0x40] sm:$0xff] }
  0xc5   :  { %v210_v39 = vmul.f32 0.7978846, %v202_v35  ;;  %v979_v46 = vpop.eup %978 }
  0xc6   :  { %v981_v48 = vpop.eup %980  ;;  %v225_v53 = vadd.f32 1.0, %v979_v46 }
  0xc7   :  { %982 = vtanh.f32 %v210_v39  ;;  %v224_v57 = vadd.f32 1.0, %v981_v48 }
  0xc8   :  { %984 = vtanh.f32 %v207_v40  ;;  %v233_v61 = vmul.f32 %v225_v53, %v169_v56  ;;  %v340_v40 = vpop.permute.xlu0 %339 }
  0xc9   :  { %986 = vtanh.f32 %v206_v42  ;;  %v232_v4 = vmul.f32 %v224_v57, %v168_v62  ;;  %v335_v42 = vpop.permute.xlu1 %334 }
  0xca   :  { %988 = vtanh.f32 %v205_v44 }
  0xcb   :  { %990 = vtanh.f32 %v204_v47 }
  0xcc   :  { %992 = vtanh.f32 %v203_v50  ;;  %v1417_v50 = vpop.permute.xlu2 %314 }
  0xcd   :  { %v983_v49 = vpop.eup %982 }
  0xce   :  { %v226_v52 = vadd.f32 1.0, %v983_v49  ;;  %v985_v54 = vpop.eup %984 }
  0xcf   :  { %v987_v58 = vpop.eup %986  ;;  %v223_v1 = vadd.f32 1.0, %v985_v54 }
  0xd0   :  { %v234_v55 = vmul.f32 %v226_v52, %v170_v51  ;;  %v989_v2 = vpop.eup %988  ;;  %v222_v6 = vadd.f32 1.0, %v987_v58  ;;  %v325_v47 = vpop.permute.xlu0 %324 }
  0xd1   :  { %v991_v7 = vpop.eup %990  ;;  %v231_v0 = vmul.f32 %v223_v1, %v167_v5  ;;  %v221_v10 = vadd.f32 1.0, %v989_v2  ;;  %v320_v53 = vpop.permute.xlu1 %319 }
  0xd2   :  { %404 = vmatpush.msra.mxu1 %v234_v55  ;;  %957 = vmatpush.msra.mxu3 %v234_v55  ;;  %v993_v12 = vpop.eup %992  ;;  %v230_v13 = vmul.f32 %v222_v6, %v166_v9  ;;  %v220_v14 = vadd.f32 1.0, %v991_v7 }
  0xd3   :  { %v229_v15 = vmul.f32 %v221_v10, %v165_v59  ;;  %v219_v16 = vadd.f32 1.0, %v993_v12 }
  0xd4   :  { %405 = vmatpush.msra.mxu1 %v233_v61  ;;  %958 = vmatpush.msra.mxu3 %v233_v61  ;;  %v228_v17 = vmul.f32 %v220_v14, %v164_v60 }
  0xd5   :  { %v227_v63 = vmul.f32 %v219_v16, %v163_v18 }
  0xd6   :  { %406 = vmatpush.msra.mxu1 %v232_v4  ;;  %959 = vmatpush.msra.mxu3 %v232_v4 }
  0xd8   :  { %407 = vmatpush.msra.mxu1 %v231_v0  ;;  %960 = vmatpush.msra.mxu3 %v231_v0  ;;  %v310_v10 = vpop.permute.xlu0 %309 }
  0xd9   :  { %v305_v18 = vpop.permute.xlu1 %304 }
  0xda   :  { %408 = vmatpush.msra.mxu1 %v230_v13  ;;  %961 = vmatpush.msra.mxu3 %v230_v13 }
  0xdc   :  { %409 = vmatpush.msra.mxu1 %v229_v15  ;;  %962 = vmatpush.msra.mxu3 %v229_v15  ;;  %v300_v15 = vpop.permute.xlu2 %299 }
  0xde   :  { %410 = vmatpush.msra.mxu1 %v228_v17  ;;  %963 = vmatpush.msra.mxu3 %v228_v17 }
  0xe0   :  { %411 = vmatpush.msra.mxu1 %v227_v63  ;;  %964 = vmatpush.msra.mxu3 %v227_v63 }
  0xe1   :  { %936 = vmatmul.msk.f32.vlgmr.msra.gmra.mxu1 %vm347_vm1, %v235_v19  ;;  %946 = vmatmul.msk.f32.vlgmr.msra.gmra.mxu3 %vm347_vm1, %v245_v3 }
  0xe9   :  { %937 = vmatmul.msk.f32.gmra.mxu1 %vm347_vm1, %v236_v8  ;;  %947 = vmatmul.msk.f32.gmra.mxu3 %vm347_vm1, %v246_v11 }
  0xf1   :  { %938 = vmatmul.msk.f32.gmra.mxu1 %vm347_vm1, %v237_v20  ;;  %948 = vmatmul.msk.f32.gmra.mxu3 %vm347_vm1, %v247_v21 }
  0xf9   :  { %939 = vmatmul.msk.f32.gmra.mxu1 %vm347_vm1, %v238_v22  ;;  %949 = vmatmul.msk.f32.gmra.mxu3 %vm347_vm1, %v248_v23 }
 0x101   :  { %940 = vmatmul.msk.f32.gmra.mxu1 %vm347_vm1, %v239_v24  ;;  %950 = vmatmul.msk.f32.gmra.mxu3 %vm347_vm1, %v249_v25 }
 0x109   :  { %941 = vmatmul.msk.f32.gmra.mxu1 %vm347_vm1, %v240_v26  ;;  %951 = vmatmul.msk.f32.gmra.mxu3 %vm347_vm1, %v250_v27  ;;  %v295_v26 = vpop.permute.xlu0 %294 }
 0x111   :  { %942 = vmatmul.msk.f32.gmra.mxu1 %vm347_vm1, %v241_v28  ;;  %v285_v28 = vpop.permute.xlu2 %284 }
 0x119   :  { %943 = vmatmul.msk.f32.gmra.mxu1 %vm347_vm1, %v242_v29 }
 0x121   :  { %944 = vmatmul.msk.f32.gmra.mxu1 %vm347_vm1, %v243_v30 }
 0x129   :  { %945 = vmatmul.msk.f32.gmra.mxu1 %vm347_vm1, %v244_v31  ;;  %v290_v31 = vpop.permute.xlu1 %289 }
 0x15e   :  { %v1402_v32 = vpop.f32.mrf.mxu1 }
 0x164   :  { %v443_v33 = vpop.f32.mrf.mxu3 }
 0x165   :  { %v1423_v55 = vadd.f32 %v443_v33, %v320_v53 }
 0x166   :  { %v1404_v34 = vpop.f32.mrf.mxu1 }
 0x167   :  { %v487_v4 = vmul.f32 0.044715, %v1423_v55 }
 0x169   :  { %v503_v14 = vmul.f32 %v487_v4, %v1423_v55  ;;  %v280_v4 = vpop.permute.xlu0 %279 }
 0x16b   :  { %v519_v8 = vmul.f32 %v503_v14, %v1423_v55 }
 0x16c   :  { %v446_v35 = vpop.f32.mrf.mxu3 }
 0x16d   :  { %v1419_v51 = vadd.f32 %v446_v35, %v325_v47  ;;  %v535_v25 = vadd.f32 %v519_v8, %v1423_v55 }
 0x16e   :  { %v1406_v36 = vpop.f32.mrf.mxu1 }
 0x16f   :  { %v488_v62 = vmul.f32 0.044715, %v1419_v51  ;;  %v551_v30 = vmul.f32 0.7978846, %v535_v25  ;;  %v472_v8 = vmul.f32 0.5, %v1419_v51 }
 0x171   :  { %v504_v0 = vmul.f32 %v488_v62, %v1419_v51 }
 0x173   :  { %v520_v17 = vmul.f32 %v504_v0, %v1419_v51  ;;  %v1466_v0 = vadd.f32 %v1406_v36, %v280_v4 }
 0x174   :  { %v449_v38 = vpop.f32.mrf.mxu3 }
 0x175   :  { %v1414_v46 = vadd.f32 %v449_v38, %v330_v41  ;;  %v536_v21 = vadd.f32 %v520_v17, %v1419_v51 }
 0x176   :  { %v1408_v39 = vpop.f32.mrf.mxu1 }
 0x177   :  { %v489_v57 = vmul.f32 0.044715, %v1414_v46  ;;  %v552_v27 = vmul.f32 0.7978846, %v536_v21 }
 0x179   :  { %v505_v2 = vmul.f32 %v489_v57, %v1414_v46 }
 0x17b   :  { %v521_v59 = vmul.f32 %v505_v2, %v1414_v46 }
 0x17c   :  { %v452_v43 = vpop.f32.mrf.mxu3 }
 0x17d   :  { %v1412_v45 = vadd.f32 %v452_v43, %v335_v42  ;;  %v537_v3 = vadd.f32 %v521_v59, %v1414_v46 }
 0x17e   :  { %v1410_v44 = vpop.f32.mrf.mxu1 }
 0x17f   :  { %v490_v49 = vmul.f32 0.044715, %v1412_v45  ;;  %v553_v24 = vmul.f32 0.7978846, %v537_v3 }
 0x181   :  { %v506_v58 = vmul.f32 %v490_v49, %v1412_v45 }
 0x183   :  { %v522_v6 = vmul.f32 %v506_v58, %v1412_v45 }
 0x184   :  { %v455_v48 = vpop.f32.mrf.mxu3 }
 0x185   :  { %v1421_v52 = vadd.f32 %v455_v48, %v340_v40  ;;  %v538_v60 = vadd.f32 %v522_v6, %v1412_v45 }
 0x186   :  { %v428_v54 = vpop.f32.mrf.mxu1 }
 0x187   :  { %v491_v56 = vmul.f32 0.044715, %v1421_v52  ;;  %v554_v11 = vmul.f32 0.7978846, %v538_v60  ;;  %v1449_v42 = vadd.f32 %v428_v54, %v295_v26  ;;  %v475_v62 = vmul.f32 0.5, %v1421_v52 }
 0x189   :  { %v507_v61 = vmul.f32 %v491_v56, %v1421_v52  ;;  %v1454_v56 = vadd.f32 %v1410_v44, %v290_v31  ;;  %v482_v44 = vmul.f32 0.044715, %v1449_v42 }
 0x18b   :  { %v523_v1 = vmul.f32 %v507_v61, %v1421_v52  ;;  %v481_v14 = vmul.f32 0.044715, %v1454_v56 }
 0x18c   :  { %v458_v5 = vpop.f32.mrf.mxu3 }
 0x18d   :  { %v459_v7 = vadd.f32 %v458_v5, %v345_v37  ;;  %v539_v13 = vadd.f32 %v523_v1, %v1421_v52  ;;  %v1461_v5 = vadd.f32 %v1408_v39, %v285_v28  ;;  %v474_v52 = vmul.f32 0.5, %v1412_v45 }
 0x18e   :  { %v431_v9 = vpop.f32.mrf.mxu1 }
 0x18f   :  { %v492_v12 = vmul.f32 0.044715, %v459_v7  ;;  %v555_v19 = vmul.f32 0.7978846, %v539_v13  ;;  %v1446_v35 = vadd.f32 %v431_v9, %v300_v15  ;;  %v476_v47 = vmul.f32 0.5, %v459_v7  ;;  %v275_v15 = vpop.permute.xlu1 %274 }
 0x191   :  { %v508_v16 = vmul.f32 %v492_v12, %v459_v7  ;;  %994 = vtanh.f32 %v555_v19  ;;  %v483_v58 = vmul.f32 0.044715, %v1446_v35  ;;  %v480_v19 = vmul.f32 0.044715, %v1461_v5 }
 0x192   :  { %996 = vtanh.f32 %v554_v11 }
 0x193   :  { %v524_v63 = vmul.f32 %v508_v16, %v459_v7  ;;  %v499_v59 = vmul.f32 %v483_v58, %v1446_v35  ;;  %v473_v16 = vmul.f32 0.5, %v1414_v46  ;;  %v496_v51 = vmul.f32 %v480_v19, %v1461_v5 }
 0x195   :  { %v540_v20 = vadd.f32 %v524_v63, %v459_v7  ;;  %v270_v7 = vpop.permute.xlu2 %269  ;;  %v498_v63 = vmul.f32 %v482_v44, %v1449_v42 }
 0x196   :  { %v434_v22 = vpop.f32.mrf.mxu1  ;;  %v1470_v13 = vadd.f32 %v1402_v32, %v270_v7 }
 0x197   :  { %v556_v23 = vmul.f32 0.7978846, %v540_v20  ;;  %v1444_v29 = vadd.f32 %v434_v22, %v305_v18  ;;  %v995_v33 = vpop.eup %994  ;;  %v1478_v18 = vadd.f32 %v1404_v34, %v275_v15  ;;  %v479_v20 = vmul.f32 0.044715, %v1466_v0 }
 0x198   :  { %v997_v37 = vpop.eup %996  ;;  %v587_v49 = vadd.f32 1.0, %v995_v33  ;;  %v515_v22 = vmul.f32 %v499_v59, %v1446_v35  ;;  %v497_v34 = vmul.f32 %v481_v14, %v1454_v56  ;;  %v514_v26 = vmul.f32 %v498_v63, %v1449_v42 }
 0x199   :  { %998 = vtanh.f32 %v556_v23  ;;  %v484_v40 = vmul.f32 0.044715, %v1444_v29  ;;  %v586_v1 = vadd.f32 1.0, %v997_v37  ;;  %v471_v23 = vmul.f32 0.5, %v1423_v55 }
 0x19a   :  { %1000 = vtanh.f32 %v553_v24  ;;  %v603_v9 = vmul.f32 %v587_v49, %v475_v62  ;;  %v477_v31 = vmul.f32 0.044715, %v1470_v13  ;;  %v513_v55 = vmul.f32 %v497_v34, %v1454_v56 }
 0x19b   :  { %1002 = vtanh.f32 %v552_v27  ;;  %v500_v54 = vmul.f32 %v484_v40, %v1444_v29  ;;  %v602_v36 = vmul.f32 %v586_v1, %v474_v52  ;;  %v478_v27 = vmul.f32 0.044715, %v1478_v18 }
 0x19c   :  { %1004 = vtanh.f32 %v551_v30  ;;  %v495_v30 = vmul.f32 %v479_v20, %v1466_v0  ;;  %v529_v62 = vadd.f32 %v513_v55, %v1454_v56 }
 0x19d   :  { %v516_v45 = vmul.f32 %v500_v54, %v1444_v29  ;;  %v494_v49 = vmul.f32 %v478_v27, %v1478_v18 }
 0x19e   :  { %v437_v38 = vpop.f32.mrf.mxu1  ;;  %v545_v4 = vmul.f32 0.7978846, %v529_v62 }
 0x19f   :  { %v999_v41 = vpop.eup %998  ;;  %v1451_v43 = vadd.f32 %v437_v38, %v310_v10  ;;  %v532_v24 = vadd.f32 %v516_v45, %v1444_v29  ;;  %v531_v38 = vadd.f32 %v515_v22, %v1446_v35 }
 0x1a0   :  { %v588_v48 = vadd.f32 1.0, %v999_v41  ;;  %v1001_v53 = vpop.eup %1000 }
 0x1a1   :  { %v485_v57 = vmul.f32 0.044715, %v1451_v43  ;;  %v1003_v2 = vpop.eup %1002  ;;  %v585_v10 = vadd.f32 1.0, %v1001_v53  ;;  %v548_v40 = vmul.f32 0.7978846, %v532_v24  ;;  %v511_v53 = vmul.f32 %v495_v30, %v1466_v0 }
 0x1a2   :  { %v604_v61 = vmul.f32 %v588_v48, %v476_v47  ;;  %v1005_v12 = vpop.eup %1004  ;;  %v584_v17 = vadd.f32 1.0, %v1003_v2  ;;  %v530_v47 = vadd.f32 %v514_v26, %v1449_v42  ;;  %v512_v48 = vmul.f32 %v496_v51, %v1461_v5 }
 0x1a3   :  { %v501_v6 = vmul.f32 %v485_v57, %v1451_v43  ;;  %v601_v3 = vmul.f32 %v585_v10, %v473_v16  ;;  %v583_v11 = vadd.f32 1.0, %v1005_v12  ;;  %v493_v57 = vmul.f32 %v477_v31, %v1470_v13 }
 0x1a4   :  { %661 = vmatpush.msra.mxu2 %v604_v61  ;;  %v547_v61 = vmul.f32 0.7978846, %v531_v38  ;;  %v546_v1 = vmul.f32 0.7978846, %v530_v47  ;;  %v528_v54 = vadd.f32 %v512_v48, %v1461_v5  ;;  %v510_v2 = vmul.f32 %v494_v49, %v1478_v18  ;;  %v609_v47 = vld [vmem:[%s1618_s5 + $0x20] sm:$0xff]  ;;  %v610_v48 = vld [vmem:[%s1618_s5 + $0x28] sm:$0xff] }
 0x1a5   :  { %v517_v39 = vmul.f32 %v501_v6, %v1451_v43  ;;  %v599_v28 = vmul.f32 %v583_v11, %v471_v23  ;;  %v527_v6 = vadd.f32 %v511_v53, %v1466_v0  ;;  %v509_v44 = vmul.f32 %v493_v57, %v1470_v13  ;;  %v611_v49 = vld [vmem:[%s1618_s5 + $0x30] sm:$0xff]  ;;  %v612_v53 = vld [vmem:[%s1618_s5 + $0x38] sm:$0xff] }
 0x1a6   :  { %v440_v60 = vpop.f32.mrf.mxu1  ;;  %662 = vmatpush.msra.mxu2 %v603_v9  ;;  %v544_v9 = vmul.f32 0.7978846, %v528_v54  ;;  %v526_v52 = vadd.f32 %v510_v2, %v1478_v18  ;;  %v469_v45 = vmul.f32 0.5, %v1451_v43  ;;  %v468_v11 = vmul.f32 0.5, %v1444_v29  ;;  %v654_v2 = vpop.permute.xlu1 %653 }
 0x1a7   :  { %v441_v32 = vadd.f32 %v440_v60, %v1417_v50  ;;  %v533_v21 = vadd.f32 %v517_v39, %v1451_v43  ;;  %v600_v50 = vmul.f32 %v584_v17, %v472_v8  ;;  %v543_v39 = vmul.f32 0.7978846, %v527_v6 }
 0x1a8   :  { %663 = vmatpush.msra.mxu2 %v602_v36  ;;  %v525_v59 = vadd.f32 %v509_v44, %v1470_v13  ;;  %v542_v16 = vmul.f32 0.7978846, %v526_v52  ;;  %v465_v29 = vmul.f32 0.5, %v1454_v56  ;;  %v462_v38 = vmul.f32 0.5, %v1478_v18  ;;  %v607_v18 = vld [vmem:[%s1618_s5 + $0x10] sm:$0xff] }
 0x1a9   :  { %v486_v46 = vmul.f32 0.044715, %v441_v32  ;;  %v549_v37 = vmul.f32 0.7978846, %v533_v21  ;;  %v470_v14 = vmul.f32 0.5, %v441_v32  ;;  %v467_v21 = vmul.f32 0.5, %v1446_v35 }
 0x1aa   :  { %664 = vmatpush.msra.mxu2 %v601_v3  ;;  %v541_v3 = vmul.f32 0.7978846, %v525_v59 }
 0x1ab   :  { %v502_v25 = vmul.f32 %v486_v46, %v441_v32  ;;  %1006 = vtanh.f32 %v549_v37 }
 0x1ac   :  { %665 = vmatpush.msra.mxu2 %v600_v50  ;;  %1008 = vtanh.f32 %v548_v40  ;;  %v466_v50 = vmul.f32 0.5, %v1449_v42  ;;  %v461_v40 = vmul.f32 0.5, %v1470_v13  ;;  %v608_v13 = vld [vmem:[%s1618_s5 + $0x18] sm:$0xff] }
 0x1ad   :  { %v518_v33 = vmul.f32 %v502_v25, %v441_v32 }
 0x1ae   :  { %666 = vmatpush.msra.mxu2 %v599_v28  ;;  %v464_v28 = vmul.f32 0.5, %v1461_v5  ;;  %v605_v5 = vld [vmem:[%s1618_s5] sm:$0xff] }
 0x1af   :  { %v534_v41 = vadd.f32 %v518_v33, %v441_v32  ;;  %v463_v33 = vmul.f32 0.5, %v1466_v0  ;;  %v606_v0 = vld [vmem:[%s1618_s5 + $0x8] sm:$0xff] }
 0x1b1   :  { %v550_v58 = vmul.f32 0.7978846, %v534_v41  ;;  %v1007_v7 = vpop.eup %1006 }
 0x1b2   :  { %v1009_v10 = vpop.eup %1008  ;;  %v581_v60 = vadd.f32 1.0, %v1007_v7  ;;  %v639_v7 = vpop.permute.xlu1 %638 }
 0x1b3   :  { %1010 = vtanh.f32 %v550_v58  ;;  %v580_v63 = vadd.f32 1.0, %v1009_v10 }
 0x1b4   :  { %1012 = vtanh.f32 %v547_v61  ;;  %v597_v8 = vmul.f32 %v581_v60, %v469_v45 }
 0x1b5   :  { %1014 = vtanh.f32 %v546_v1  ;;  %v596_v32 = vmul.f32 %v580_v63, %v468_v11  ;;  %v659_v1 = vpop.permute.xlu0 %658 }
 0x1b6   :  { %1016 = vtanh.f32 %v545_v4  ;;  %v649_v4 = vpop.permute.xlu2 %648 }
 0x1b7   :  { %1018 = vtanh.f32 %v544_v9 }
 0x1b8   :  { %1020 = vtanh.f32 %v543_v39 }
 0x1b9   :  { %v1011_v12 = vpop.eup %1010  ;;  %1022 = vtanh.f32 %v542_v16 }
 0x1ba   :  { %v582_v15 = vadd.f32 1.0, %v1011_v12  ;;  %v1013_v36 = vpop.eup %1012  ;;  %1024 = vtanh.f32 %v541_v3  ;;  %v624_v45 = vpop.permute.xlu1 %623 }
 0x1bb   :  { %v1015_v19 = vpop.eup %1014  ;;  %v579_v20 = vadd.f32 1.0, %v1013_v36 }
 0x1bc   :  { %v598_v17 = vmul.f32 %v582_v15, %v470_v14  ;;  %v1017_v46 = vpop.eup %1016  ;;  %v578_v22 = vadd.f32 1.0, %v1015_v19 }
 0x1bd   :  { %v1019_v34 = vpop.eup %1018  ;;  %v595_v43 = vmul.f32 %v579_v20, %v467_v21  ;;  %v577_v23 = vadd.f32 1.0, %v1017_v46  ;;  %v644_v44 = vpop.permute.xlu0 %643 }
 0x1be   :  { %667 = vmatpush.msra.mxu2 %v598_v17  ;;  %v1021_v24 = vpop.eup %1020  ;;  %v594_v25 = vmul.f32 %v578_v22, %v466_v50  ;;  %v576_v26 = vadd.f32 1.0, %v1019_v34  ;;  %v634_v14 = vpop.permute.xlu2 %633 }
 0x1bf   :  { %v1023_v51 = vpop.eup %1022  ;;  %v593_v27 = vmul.f32 %v577_v23, %v465_v29  ;;  %v575_v35 = vadd.f32 1.0, %v1021_v24 }
 0x1c0   :  { %668 = vmatpush.msra.mxu2 %v597_v8  ;;  %v1025_v30 = vpop.eup %1024  ;;  %v592_v31 = vmul.f32 %v576_v26, %v464_v28  ;;  %v574_v37 = vadd.f32 1.0, %v1023_v51 }
 0x1c1   :  { %v591_v42 = vmul.f32 %v575_v35, %v463_v33  ;;  %v573_v55 = vadd.f32 1.0, %v1025_v30 }
 0x1c2   :  { %669 = vmatpush.msra.mxu2 %v596_v32  ;;  %v590_v56 = vmul.f32 %v574_v37, %v462_v38 }
 0x1c3   :  { %v589_v41 = vmul.f32 %v573_v55, %v461_v40 }
 0x1c4   :  { %670 = vmatpush.msra.mxu2 %v595_v43 }
 0x1c5   :  { %v629_v16 = vpop.permute.xlu0 %628 }
 0x1c6   :  { %671 = vmatpush.msra.mxu2 %v594_v25 }
 0x1c8   :  { %672 = vmatpush.msra.mxu2 %v593_v27 }
 0x1ca   :  { %673 = vmatpush.msra.mxu2 %v592_v31 }
 0x1cc   :  { %674 = vmatpush.msra.mxu2 %v591_v42 }
 0x1ce   :  { %675 = vmatpush.msra.mxu2 %v590_v56 }
 0x1d0   :  { %676 = vmatpush.msra.mxu2 %v589_v41 }
 0x1d1   :  { %677 = vmatmul.f32.vlgmr.msra.gmra.mxu2 %v605_v5 }
 0x1d9   :  { %680 = vmatmul.f32.gmra.mxu2 %v606_v0 }
 0x1e1   :  { %683 = vmatmul.f32.gmra.mxu2 %v607_v18 }
 0x1e9   :  { %686 = vmatmul.f32.gmra.mxu2 %v608_v13 }
 0x1f1   :  { %689 = vmatmul.f32.gmra.mxu2 %v609_v47 }
 0x1f9   :  { %692 = vmatmul.f32.gmra.mxu2 %v610_v48 }
 0x201   :  { %695 = vmatmul.f32.gmra.mxu2 %v611_v49 }
 0x209   :  { %698 = vmatmul.f32.gmra.mxu2 %v612_v53 }
 0x254   :  { %v678_v57 = vpop.f32.mrf.mxu2 }
 0x255   :  { %v1560_v8 = vadd.f32 %v678_v57, %v624_v45 }
 0x257   :  { %v710_v50 = vmul.f32 0.044715, %v1560_v8 }
 0x259   :  { %v718_v35 = vmul.f32 %v710_v50, %v1560_v8  ;;  %v800_v50 = vpop.permute.xlu2 %799 }
 0x25b   :  { %v726_v40 = vmul.f32 %v718_v35, %v1560_v8 }
 0x25c   :  { %v681_v58 = vpop.f32.mrf.mxu2 }
 0x25d   :  { %v1556_v63 = vadd.f32 %v681_v58, %v629_v16  ;;  %v734_v48 = vadd.f32 %v726_v40, %v1560_v8  ;;  %v795_v40 = vpop.permute.xlu0 %794 }
 0x25f   :  { %v711_v43 = vmul.f32 0.044715, %v1556_v63 }
 0x261   :  { %v719_v28 = vmul.f32 %v711_v43, %v1556_v63  ;;  %v774_v43 = vld [vmem:[%s1620_s7] sm:$0xff] }
 0x263   :  { %v727_v56 = vmul.f32 %v719_v28, %v1556_v63 }
 0x264   :  { %v684_v61 = vpop.f32.mrf.mxu2 }
 0x265   :  { %v1551_v15 = vadd.f32 %v684_v61, %v634_v14  ;;  %v735_v13 = vadd.f32 %v727_v56, %v1556_v63  ;;  %v742_v61 = vmul.f32 0.7978846, %v734_v48 }
 0x267   :  { %v712_v46 = vmul.f32 0.044715, %v1551_v15  ;;  %v743_v53 = vmul.f32 0.7978846, %v735_v13 }
 0x269   :  { %v720_v29 = vmul.f32 %v712_v46, %v1551_v15 }
 0x26b   :  { %v728_v37 = vmul.f32 %v720_v29, %v1551_v15 }
 0x26c   :  { %v687_v62 = vpop.f32.mrf.mxu2 }
 0x26d   :  { %v1547_v39 = vadd.f32 %v687_v62, %v639_v7  ;;  %v736_v0 = vadd.f32 %v728_v37, %v1551_v15 }
 0x26f   :  { %v713_v3 = vmul.f32 0.044715, %v1547_v39  ;;  %v744_v47 = vmul.f32 0.7978846, %v736_v0 }
 0x271   :  { %v721_v34 = vmul.f32 %v713_v3, %v1547_v39 }
 0x273   :  { %v729_v27 = vmul.f32 %v721_v34, %v1547_v39  ;;  %v702_v34 = vmul.f32 0.5, %v1560_v8  ;;  %v776_v8 = vld [vmem:[%s1620_s7 + $0x10] sm:$0xff] }
 0x274   :  { %v690_v54 = vpop.f32.mrf.mxu2 }
 0x275   :  { %v1544_v52 = vadd.f32 %v690_v54, %v644_v44  ;;  %v737_v55 = vadd.f32 %v729_v27, %v1547_v39 }
 0x277   :  { %v714_v36 = vmul.f32 0.044715, %v1544_v52  ;;  %v745_v18 = vmul.f32 0.7978846, %v737_v55  ;;  %v706_v16 = vmul.f32 0.5, %v1544_v52 }
 0x279   :  { %v722_v20 = vmul.f32 %v714_v36, %v1544_v52 }
 0x27b   :  { %v730_v25 = vmul.f32 %v722_v20, %v1544_v52 }
 0x27c   :  { %v693_v6 = vpop.f32.mrf.mxu2 }
 0x27d   :  { %v1542_v9 = vadd.f32 %v693_v6, %v649_v4  ;;  %v738_v33 = vadd.f32 %v730_v25, %v1544_v52  ;;  %v703_v52 = vmul.f32 0.5, %v1556_v63  ;;  %v775_v63 = vld [vmem:[%s1620_s7 + $0x8] sm:$0xff] }
 0x27f   :  { %v715_v12 = vmul.f32 0.044715, %v1542_v9  ;;  %v746_v5 = vmul.f32 0.7978846, %v738_v33 }
 0x281   :  { %v723_v17 = vmul.f32 %v715_v12, %v1542_v9  ;;  %v707_v12 = vmul.f32 0.5, %v1542_v9 }
 0x283   :  { %v731_v21 = vmul.f32 %v723_v17, %v1542_v9 }
 0x284   :  { %v696_v10 = vpop.f32.mrf.mxu2 }
 0x285   :  { %v1549_v59 = vadd.f32 %v696_v10, %v654_v2  ;;  %v739_v26 = vadd.f32 %v731_v21, %v1542_v9  ;;  %v704_v9 = vmul.f32 0.5, %v1551_v15  ;;  %v777_v15 = vld [vmem:[%s1620_s7 + $0x18] sm:$0xff] }
 0x287   :  { %v716_v60 = vmul.f32 0.044715, %v1549_v59  ;;  %v747_v42 = vmul.f32 0.7978846, %v739_v26  ;;  %v708_v6 = vmul.f32 0.5, %v1549_v59 }
 0x289   :  { %v724_v19 = vmul.f32 %v716_v60, %v1549_v59 }
 0x28b   :  { %v732_v11 = vmul.f32 %v724_v19, %v1549_v59  ;;  %v705_v19 = vmul.f32 0.5, %v1547_v39 }
 0x28c   :  { %v699_v32 = vpop.f32.mrf.mxu2 }
 0x28d   :  { %v700_v22 = vadd.f32 %v699_v32, %v659_v1  ;;  %v740_v24 = vadd.f32 %v732_v11, %v1549_v59 }
 0x28f   :  { %v717_v23 = vmul.f32 0.044715, %v700_v22  ;;  %v748_v31 = vmul.f32 0.7978846, %v740_v24  ;;  %v709_v62 = vmul.f32 0.5, %v700_v22  ;;  %v785_v24 = vpop.permute.xlu2 %784 }
 0x291   :  { %v725_v51 = vmul.f32 %v717_v23, %v700_v22  ;;  %1026 = vtanh.f32 %v748_v31 }
 0x292   :  { %1028 = vtanh.f32 %v747_v42 }
 0x293   :  { %v733_v30 = vmul.f32 %v725_v51, %v700_v22  ;;  %v790_v51 = vpop.permute.xlu1 %789 }
 0x295   :  { %v741_v38 = vadd.f32 %v733_v30, %v700_v22 }
 0x297   :  { %v749_v41 = vmul.f32 0.7978846, %v741_v38  ;;  %v1027_v49 = vpop.eup %1026 }
 0x298   :  { %v1029_v57 = vpop.eup %1028  ;;  %v764_v54 = vadd.f32 1.0, %v1027_v49 }
 0x299   :  { %1030 = vtanh.f32 %v749_v41  ;;  %v763_v44 = vadd.f32 1.0, %v1029_v57 }
 0x29a   :  { %1032 = vtanh.f32 %v746_v5  ;;  %v772_v10 = vmul.f32 %v764_v54, %v708_v6 }
 0x29b   :  { %1034 = vtanh.f32 %v745_v18  ;;  %v771_v36 = vmul.f32 %v763_v44, %v707_v12 }
 0x29c   :  { %1036 = vtanh.f32 %v744_v47 }
 0x29d   :  { %1038 = vtanh.f32 %v743_v53 }
 0x29e   :  { %1040 = vtanh.f32 %v742_v61 }
 0x29f   :  { %v1031_v58 = vpop.eup %1030 }
 0x2a0   :  { %v765_v1 = vadd.f32 1.0, %v1031_v58  ;;  %v1033_v2 = vpop.eup %1032 }
 0x2a1   :  { %v1035_v7 = vpop.eup %1034  ;;  %v762_v14 = vadd.f32 1.0, %v1033_v2 }
 0x2a2   :  { %v773_v4 = vmul.f32 %v765_v1, %v709_v62  ;;  %v1037_v60 = vpop.eup %1036  ;;  %v761_v17 = vadd.f32 1.0, %v1035_v7 }
 0x2a3   :  { %v1039_v45 = vpop.eup %1038  ;;  %v770_v59 = vmul.f32 %v762_v14, %v706_v16  ;;  %v760_v3 = vadd.f32 1.0, %v1037_v60 }
 0x2a4   :  { %822 = vmatpush.msrb.mxu0 %v773_v4  ;;  %965 = vmatpush.msrb.mxu3 %v773_v4  ;;  %v1041_v11 = vpop.eup %1040  ;;  %v769_v20 = vmul.f32 %v761_v17, %v705_v19  ;;  %v759_v46 = vadd.f32 1.0, %v1039_v45  ;;  %v879_v19 = vld [vmem:[%s1622_s9] sm:$0xf] }
 0x2a5   :  { %v768_v32 = vmul.f32 %v760_v3, %v704_v9  ;;  %v758_v21 = vadd.f32 1.0, %v1041_v11  ;;  %v884_v3 = vpop.permute.xlu0 %883 }
 0x2a6   :  { %823 = vmatpush.msrb.mxu0 %v772_v10  ;;  %966 = vmatpush.msrb.mxu3 %v772_v10  ;;  %v767_v22 = vmul.f32 %v759_v46, %v703_v52 }
 0x2a7   :  { %v766_v39 = vmul.f32 %v758_v21, %v702_v34 }
 0x2a8   :  { %824 = vmatpush.msrb.mxu0 %v771_v36  ;;  %967 = vmatpush.msrb.mxu3 %v771_v36 }
 0x2aa   :  { %825 = vmatpush.msrb.mxu0 %v770_v59  ;;  %968 = vmatpush.msrb.mxu3 %v770_v59 }
 0x2ac   :  { %826 = vmatpush.msrb.mxu0 %v769_v20  ;;  %969 = vmatpush.msrb.mxu3 %v769_v20 }
 0x2ae   :  { %827 = vmatpush.msrb.mxu0 %v768_v32  ;;  %970 = vmatpush.msrb.mxu3 %v768_v32 }
 0x2b0   :  { %828 = vmatpush.msrb.mxu0 %v767_v22  ;;  %971 = vmatpush.msrb.mxu3 %v767_v22 }
 0x2b2   :  { %829 = vmatpush.msrb.mxu0 %v766_v39  ;;  %972 = vmatpush.msrb.mxu3 %v766_v39 }
 0x2b3   :  { %952 = vmatmul.msk.f32.vlgmr.msrb.gmra.mxu0 %vm347_vm1, %v774_v43  ;;  %955 = vmatmul.msk.f32.vlgmr.msrb.gmra.mxu3 %vm347_vm1, %v777_v15 }
 0x2bb   :  { %953 = vmatmul.msk.f32.gmra.mxu0 %vm347_vm1, %v775_v63 }
 0x2c3   :  { %954 = vmatmul.msk.f32.gmra.mxu0 %vm347_vm1, %v776_v8 }
 0x330   :  { %v831_v23 = vpop.f32.mrf.mxu0 }
 0x331   :  { %v832_v25 = vadd.f32 %v831_v23, %v785_v24 }
 0x333   :  { %v847_v27 = vmul.f32 0.044715, %v832_v25  ;;  %v843_v45 = vmul.f32 0.5, %v832_v25 }
 0x335   :  { %v851_v37 = vmul.f32 %v847_v27, %v832_v25 }
 0x336   :  { %v840_v29 = vpop.f32.mrf.mxu3 }
 0x337   :  { %v841_v26 = vadd.f32 %v840_v29, %v800_v50  ;;  %v855_v5 = vmul.f32 %v851_v37, %v832_v25 }
 0x338   :  { %v834_v28 = vpop.f32.mrf.mxu0 }
 0x339   :  { %v850_v35 = vmul.f32 0.044715, %v841_v26  ;;  %v835_v30 = vadd.f32 %v834_v28, %v790_v51  ;;  %v859_v48 = vadd.f32 %v855_v5, %v832_v25  ;;  %v846_v1 = vmul.f32 0.5, %v841_v26 }
 0x33b   :  { %v854_v31 = vmul.f32 %v850_v35, %v841_v26  ;;  %v848_v33 = vmul.f32 0.044715, %v835_v30  ;;  %v863_v58 = vmul.f32 0.7978846, %v859_v48  ;;  %v844_v36 = vmul.f32 0.5, %v835_v30 }
 0x33d   :  { %v858_v42 = vmul.f32 %v854_v31, %v841_v26  ;;  %v852_v38 = vmul.f32 %v848_v33, %v835_v30 }
 0x33f   :  { %v862_v55 = vadd.f32 %v858_v42, %v841_v26  ;;  %v856_v56 = vmul.f32 %v852_v38, %v835_v30 }
 0x340   :  { %v837_v41 = vpop.f32.mrf.mxu0 }
 0x341   :  { %v838_v0 = vadd.f32 %v837_v41, %v795_v40  ;;  %v866_v18 = vmul.f32 0.7978846, %v862_v55  ;;  %v860_v47 = vadd.f32 %v856_v56, %v835_v30 }
 0x343   :  { %v849_v13 = vmul.f32 0.044715, %v838_v0  ;;  %1042 = vtanh.f32 %v866_v18  ;;  %v864_v57 = vmul.f32 0.7978846, %v860_v47  ;;  %v845_v10 = vmul.f32 0.5, %v838_v0 }
 0x345   :  { %v853_v49 = vmul.f32 %v849_v13, %v838_v0  ;;  %1044 = vtanh.f32 %v864_v57 }
 0x346   :  { %1046 = vtanh.f32 %v863_v58 }
 0x347   :  { %v857_v53 = vmul.f32 %v853_v49, %v838_v0 }
 0x349   :  { %v1043_v61 = vpop.eup %1042  ;;  %v861_v62 = vadd.f32 %v857_v53, %v838_v0 }
 0x34a   :  { %v874_v54 = vadd.f32 1.0, %v1043_v61 }
 0x34b   :  { %v865_v2 = vmul.f32 0.7978846, %v861_v62  ;;  %v1045_v6 = vpop.eup %1044 }
 0x34c   :  { %v878_v4 = vmul.f32 %v874_v54, %v846_v1  ;;  %v1047_v44 = vpop.eup %1046  ;;  %v872_v14 = vadd.f32 1.0, %v1045_v6 }
 0x34d   :  { %1048 = vtanh.f32 %v865_v2  ;;  %v871_v16 = vadd.f32 1.0, %v1047_v44 }
 0x34e   :  { %902 = vmatpush.msra.mxu3 %v878_v4  ;;  %v876_v17 = vmul.f32 %v872_v14, %v844_v36 }
 0x34f   :  { %v875_v59 = vmul.f32 %v871_v16, %v843_v45 }
 0x353   :  { %v1049_v7 = vpop.eup %1048 }
 0x354   :  { %v873_v12 = vadd.f32 1.0, %v1049_v7 }
 0x356   :  { %v877_v60 = vmul.f32 %v873_v12, %v845_v10 }
 0x358   :  { %903 = vmatpush.msra.mxu3 %v877_v60 }
 0x35a   :  { %904 = vmatpush.msra.mxu3 %v876_v17 }
 0x35c   :  { %905 = vmatpush.msra.mxu3 %v875_v59 }
 0x35d   :  { %956 = vmatmul.msk.f32.vlgmr.msra.gmra.mxu3 %vm886_vm2, %v879_v19 }
 0x3e0   :  { %v907_v11 = vpop.f32.mrf.mxu3 }
 0x3e1   :  { %v908_v20 = vadd.f32 %v907_v11, %v884_v3 }
 0x3e3   :  { %1050 = vtanh.f32 %v908_v20 }
 0x3e9   :  { %v1051_v9 = vpop.eup %1050 }
 0x3ea   :  { %911 = vst [vmem:[#allocation2] sm:$0xf] %v1051_v9 }
 0x3eb   :  { %922 = dma.vmem_to_hbm [thread:$0]  %s918_s27, 64, %s920_s1, [#allocation3]  }
 0x3ec   :  { %1076 = dma.done.wait [#allocation3], 64  }
 0x3ed   :  { %1077 = vsyncadd [#allocation3], 4294967232 }
 0x3ee   :  { %927 = vsyncpa [#allocation3], 1 }

</bundles_post_ra>
